<compile_context>
chip_gen: v6e
topology: v6e:2x2x1
jax: 0.10.0
libtpu: 0.0.40
codegen_flags: <defaults>
</compile_context>

<pallas_src>
import math
from functools import partial

import jax
import jax.numpy as jnp
from jax.experimental import pallas as pl
from jax.experimental.pallas import tpu as pltpu


def _neuralef_fwd_kernel(x_ref, w1_ref, b1_ref, w2_ref, b2_ref, w3_ref, b3_ref,
                         raw_ref, *, kernel_type, compute_dtype):
    """Fused 3-layer forward for all k eigenfunctions on one batch tile.

    [TN,D]@[D,kH] -> act -> [TN,kH]@[kH,kH] (block-diag) -> act
    -> [TN,kH]@[kH,k] (block-diag) = ret_raw tile.
    """
    def act(v):
        if kernel_type == "relu":
            return jnp.maximum(v, 0.0)
        elif kernel_type == "erf":
            return jax.lax.erf(v)
        else:
            raise ValueError(f"unsupported kernel_type {kernel_type}")

    def mm(a, w_ref):
        # Weights are pre-cast on the wrapper; activations cast here (no-op for f32).
        return jnp.dot(a.astype(compute_dtype), w_ref[...],
                       preferred_element_type=jnp.float32)

    h = act(mm(x_ref[...], w1_ref) + b1_ref[...])            # [TN, kH]
    h = act(mm(h, w2_ref) + b2_ref[...])                      # [TN, kH]
    raw_ref[...] = mm(h, w3_ref) + b3_ref[...]                # [TN, k]
    # NOTE: rows past the true batch end (last-tile overhang) hold garbage, but
    # every op above is row-wise independent and Pallas clips the writeback, so
    # no masking is needed and nothing leaks into the wrapper-side reduction.


def neural_eigen_functions_forward(x, w1, b1, w2, b2, w3, b3, kernel_type="relu",
                                   use_bf16_matmul=False):
    """Pallas wrapper. Returns (normalized output [N, k], eigennorm [1, k])."""
    n, d = x.shape
    k, _, h_dim = w1.shape
    kh = k * h_dim
    compute_dtype = jnp.bfloat16 if use_bf16_matmul else jnp.float32

    # ---- one-time wrapper-side weight fusion (layout prep, no per-step cost) ----
    w1c = jnp.transpose(w1, (1, 0, 2)).reshape(d, kh).astype(compute_dtype)  # [D, k*H]
    w2bd = jax.scipy.linalg.block_diag(*w2).astype(compute_dtype)            # [k*H, k*H]
    w3bd = jax.scipy.linalg.block_diag(*w3).astype(compute_dtype)            # [k*H, k]
    b1c = b1.reshape(1, kh).astype(jnp.float32)
    b2c = b2.reshape(1, kh).astype(jnp.float32)
    b3c = b3.reshape(1, k).astype(jnp.float32)

    # Batch tile: whole batch if small, else 4096 rows (multiple of 8).  VMEM
    # footprint at tn=4096 is ~6-7 MB (two [tn,128] f32 activations dominate),
    # safely under every generation's scoped-VMEM budget.
    TN_CAP = 4096
    tn = n if n <= TN_CAP else TN_CAP
    num_tiles = pl.cdiv(n, tn)
    resident = lambda i: (0, 0)   # weights/biases stay VMEM-resident across tiles

    fwd = pl.pallas_call(
        partial(_neuralef_fwd_kernel, kernel_type=kernel_type,
                compute_dtype=compute_dtype),
        out_shape=jax.ShapeDtypeStruct((n, k), jnp.float32),   # unnormalized ret_raw
        grid_spec=pltpu.PrefetchScalarGridSpec(
            num_scalar_prefetch=0,
            grid=(num_tiles,),
            in_specs=[
                pl.BlockSpec((tn, d), lambda i: (i, 0)),        # x tile
                pl.BlockSpec((d, kh), resident),                # W1c
                pl.BlockSpec((1, kh), resident),                # b1c
                pl.BlockSpec((kh, kh), resident),               # W2bd
                pl.BlockSpec((1, kh), resident),                # b2c
                pl.BlockSpec((kh, k), resident),                # W3bd
                pl.BlockSpec((1, k), resident),                 # b3c
            ],
            out_specs=pl.BlockSpec((tn, k), lambda i: (i, 0)),  # ret_raw tile
        ),
        compiler_params=pltpu.CompilerParams(
            # No cross-tile accumulator anymore -> pure "parallel" batch axis, so
            # both v7x TensorCores share the grid (no effect on v5e/v6e).
            dimension_semantics=("parallel",),
            # Explicit limit: safe on v5e/v6e (128 MiB physical) and within v7x's
            # 64 MiB physical; well above the ~6-7 MB actual footprint.
            vmem_limit_bytes=32 * 1024 * 1024,
        ),
    )
    ret_raw = fwd(x.astype(jnp.float32), w1c, b1c, w2bd, b2c, w3bd, b3c)

    # Normalization in plain XLA: a k(=4)-wide Pallas pass would be pure masked-store
    # + grid-step overhead; this is one cheap fused reduce + elementwise divide.
    sumsq = jnp.sum(ret_raw * ret_raw, axis=0, keepdims=True)   # [1, k]
    eigennorm = jnp.sqrt(sumsq * (1.0 / n))                     # [1, k]
    out = ret_raw / eigennorm
    return out, eigennorm
    # TODO(synk): the momentum EMA of eigennorm (num_calls > 0 branch) and the
    # num_calls counter are host-side buffer state; only the first-call
    # (num_calls == 0) training semantics are reproduced here.


def _reference_forward(x, w1, b1, w2, b2, w3, b3, kernel_type="relu"):
    """Pure-JAX reference matching the PyTorch forward (training, first call)."""
    act = (lambda v: jnp.maximum(v, 0.0)) if kernel_type == "relu" else jax.lax.erf
    cols = []
    for j in range(w1.shape[0]):
        h = act(x @ w1[j] + b1[j])
        h = act(h @ w2[j] + b2[j])
        cols.append(h @ w3[j] + b3[j])
    ret_raw = jnp.concatenate(cols, axis=1)
    norm = jnp.linalg.norm(ret_raw, axis=0) / math.sqrt(ret_raw.shape[0])
    return ret_raw / norm, norm[None, :]


if __name__ == "__main__":
    # Small shapes consistent with the toy module: k eigenfunctions, 2-D inputs.
    N, D, H, K = 8, 2, 32, 4
    kernel_type = "relu"

    key = jax.random.PRNGKey(0)
    kx, k1, k2, k3, k4, k5, k6, kx2 = jax.random.split(key, 8)

    x = jax.random.normal(kx, (N, D), dtype=jnp.float32)

    # PyTorch-style uniform(-1/sqrt(fan_in), 1/sqrt(fan_in)) deterministic init.
    def uinit(k_, shape, fan_in):
        bound = 1.0 / math.sqrt(fan_in)
        return jax.random.uniform(k_, shape, jnp.float32, -bound, bound)

    w1 = uinit(k1, (K, D, H), D)
    b1 = uinit(k2, (K, H), D)
    w2 = uinit(k3, (K, H, H), H)
    b2 = uinit(k4, (K, H), H)
    w3 = uinit(k5, (K, H, 1), H)
    b3 = uinit(k6, (K, 1), H)

    # --- small single-tile test (matches the module's toy usage) ---
    out, eigennorm = neural_eigen_functions_forward(
        x, w1, b1, w2, b2, w3, b3, kernel_type=kernel_type)
    jax.block_until_ready(out)
    jax.block_until_ready(eigennorm)

    ref_out, ref_norm = _reference_forward(x, w1, b1, w2, b2, w3, b3, kernel_type)
    assert out.shape == (N, K) and eigennorm.shape == (1, K)
    assert jnp.allclose(out, ref_out, rtol=1e-5, atol=1e-5)
    assert jnp.allclose(eigennorm, ref_norm, rtol=1e-5, atol=1e-5)

    # --- multi-tile test with a last-tile overhang (exercises the clipped
    #     writeback path and the parallel grid axis) ---
    N2 = 8200   # 3 tiles of 4096, last tile holds only 8 valid rows
    x2 = jax.random.normal(kx2, (N2, D), dtype=jnp.float32)
    out2, norm2 = neural_eigen_functions_forward(
        x2, w1, b1, w2, b2, w3, b3, kernel_type=kernel_type)
    jax.block_until_ready(out2)
    ref_out2, ref_norm2 = _reference_forward(x2, w1, b1, w2, b2, w3, b3, kernel_type)
    assert out2.shape == (N2, K)
    assert jnp.allclose(out2, ref_out2, rtol=1e-4, atol=1e-5)
    assert jnp.allclose(norm2, ref_norm2, rtol=1e-4, atol=1e-5)

    print("KERNEL_OK")
</pallas_src>

<mosaic_0001>
module attributes {stable_mosaic.version = 11 : i64} {
  func.func @_neuralef_fwd_kernel(%arg0: i32, %arg1: memref<8x2xf32, #tpu.memory_space<vmem>>, %arg2: memref<2x128xf32, #tpu.memory_space<vmem>>, %arg3: memref<1x128xf32, #tpu.memory_space<vmem>>, %arg4: memref<128x128xf32, #tpu.memory_space<vmem>>, %arg5: memref<1x128xf32, #tpu.memory_space<vmem>>, %arg6: memref<128x4xf32, #tpu.memory_space<vmem>>, %arg7: memref<1x4xf32, #tpu.memory_space<vmem>>, %arg8: memref<8x4xf32, #tpu.memory_space<vmem>>) attributes {dimension_semantics = [#tpu.dimension_semantics<parallel>], iteration_bounds = array<i64: 1>, scalar_prefetch = 0 : i64, scratch_operands = 0 : i64, tpu.core_type = #tpu.core_type<tc>, window_params = [{transform_indices = @transform_0, window_bounds = array<i64: 8, 2>}, {pipeline_mode = #tpu.pipeline_mode<synchronous>, transform_indices = @transform_1, window_bounds = array<i64: 2, 128>}, {pipeline_mode = #tpu.pipeline_mode<synchronous>, transform_indices = @transform_2, window_bounds = array<i64: 1, 128>}, {pipeline_mode = #tpu.pipeline_mode<synchronous>, transform_indices = @transform_3, window_bounds = array<i64: 128, 128>}, {pipeline_mode = #tpu.pipeline_mode<synchronous>, transform_indices = @transform_4, window_bounds = array<i64: 1, 128>}, {pipeline_mode = #tpu.pipeline_mode<synchronous>, transform_indices = @transform_5, window_bounds = array<i64: 128, 4>}, {pipeline_mode = #tpu.pipeline_mode<synchronous>, transform_indices = @transform_6, window_bounds = array<i64: 1, 4>}, {transform_indices = @transform_7, window_bounds = array<i64: 8, 4>}]} {
    %c0 = arith.constant 0 : index
    %c0_0 = arith.constant 0 : index
    %0 = vector.load %arg1[%c0, %c0_0] : memref<8x2xf32, #tpu.memory_space<vmem>>, vector<8x2xf32>
    %c0_1 = arith.constant 0 : index
    %c0_2 = arith.constant 0 : index
    %1 = vector.load %arg2[%c0_1, %c0_2] : memref<2x128xf32, #tpu.memory_space<vmem>>, vector<2x128xf32>
    %cst = arith.constant dense<0.000000e+00> : vector<8x128xf32>
    %2 = tpu.matmul %0, %1, %cst {dimension_numbers = #tpu.dot_dimension_numbers<[1], [0], [0], [1], [0, 0, 1, 1], [], []>} : vector<8x2xf32>, vector<2x128xf32>, vector<8x128xf32> -> vector<8x128xf32>
    %c0_3 = arith.constant 0 : index
    %c0_4 = arith.constant 0 : index
    %3 = vector.load %arg3[%c0_3, %c0_4] : memref<1x128xf32, #tpu.memory_space<vmem>>, vector<1x128xf32>
    %4 = vector.broadcast %3 : vector<1x128xf32> to vector<8x128xf32>
    %5 = arith.addf %2, %4 : vector<8x128xf32>
    %cst_5 = arith.constant 0.000000e+00 : f32
    %6 = vector.broadcast %cst_5 : f32 to vector<8x128xf32>
    %7 = arith.maximumf %5, %6 : vector<8x128xf32>
    %c0_6 = arith.constant 0 : index
    %c0_7 = arith.constant 0 : index
    %8 = vector.load %arg4[%c0_6, %c0_7] : memref<128x128xf32, #tpu.memory_space<vmem>>, vector<128x128xf32>
    %cst_8 = arith.constant dense<0.000000e+00> : vector<8x128xf32>
    %9 = tpu.matmul %7, %8, %cst_8 {dimension_numbers = #tpu.dot_dimension_numbers<[1], [0], [0], [1], [0, 0, 1, 1], [], []>} : vector<8x128xf32>, vector<128x128xf32>, vector<8x128xf32> -> vector<8x128xf32>
    %c0_9 = arith.constant 0 : index
    %c0_10 = arith.constant 0 : index
    %10 = vector.load %arg5[%c0_9, %c0_10] : memref<1x128xf32, #tpu.memory_space<vmem>>, vector<1x128xf32>
    %11 = vector.broadcast %10 : vector<1x128xf32> to vector<8x128xf32>
    %12 = arith.addf %9, %11 : vector<8x128xf32>
    %cst_11 = arith.constant 0.000000e+00 : f32
    %13 = vector.broadcast %cst_11 : f32 to vector<8x128xf32>
    %14 = arith.maximumf %12, %13 : vector<8x128xf32>
    %c0_12 = arith.constant 0 : index
    %c0_13 = arith.constant 0 : index
    %15 = vector.load %arg6[%c0_12, %c0_13] : memref<128x4xf32, #tpu.memory_space<vmem>>, vector<128x4xf32>
    %cst_14 = arith.constant dense<0.000000e+00> : vector<8x4xf32>
    %16 = tpu.matmul %14, %15, %cst_14 {dimension_numbers = #tpu.dot_dimension_numbers<[1], [0], [0], [1], [0, 0, 1, 1], [], []>} : vector<8x128xf32>, vector<128x4xf32>, vector<8x4xf32> -> vector<8x4xf32>
    %c0_15 = arith.constant 0 : index
    %c0_16 = arith.constant 0 : index
    %17 = vector.load %arg7[%c0_15, %c0_16] : memref<1x4xf32, #tpu.memory_space<vmem>>, vector<1x4xf32>
    %18 = vector.broadcast %17 : vector<1x4xf32> to vector<8x4xf32>
    %19 = arith.addf %16, %18 : vector<8x4xf32>
    %c0_17 = arith.constant 0 : index
    %c0_18 = arith.constant 0 : index
    %20 = vector.load %arg8[%c0_17, %c0_18] : memref<8x4xf32, #tpu.memory_space<vmem>>, vector<8x4xf32>
    tpu.vector_store %arg8[%c0_17, %c0_18], %19 {strides = array<i32>} : memref<8x4xf32, #tpu.memory_space<vmem>>, vector<8x4xf32>,
    return
  }
  func.func @transform_0(%arg0: i32) -> (i32, i32) {
    %c0_i32 = arith.constant 0 : i32
    %c0_i32_0 = arith.constant 0 : i32
    return %arg0, %c0_i32 : i32, i32
  }
  func.func @transform_1(%arg0: i32) -> (i32, i32) {
    %c0_i32 = arith.constant 0 : i32
    %c0_i32_0 = arith.constant 0 : i32
    %c0_i32_1 = arith.constant 0 : i32
    return %c0_i32, %c0_i32_0 : i32, i32
  }
  func.func @transform_2(%arg0: i32) -> (i32, i32) {
    %c0_i32 = arith.constant 0 : i32
    %c0_i32_0 = arith.constant 0 : i32
    %c0_i32_1 = arith.constant 0 : i32
    return %c0_i32, %c0_i32_0 : i32, i32
  }
  func.func @transform_3(%arg0: i32) -> (i32, i32) {
    %c0_i32 = arith.constant 0 : i32
    %c0_i32_0 = arith.constant 0 : i32
    %c0_i32_1 = arith.constant 0 : i32
    return %c0_i32, %c0_i32_0 : i32, i32
  }
  func.func @transform_4(%arg0: i32) -> (i32, i32) {
    %c0_i32 = arith.constant 0 : i32
    %c0_i32_0 = arith.constant 0 : i32
    %c0_i32_1 = arith.constant 0 : i32
    return %c0_i32, %c0_i32_0 : i32, i32
  }
  func.func @transform_5(%arg0: i32) -> (i32, i32) {
    %c0_i32 = arith.constant 0 : i32
    %c0_i32_0 = arith.constant 0 : i32
    %c0_i32_1 = arith.constant 0 : i32
    return %c0_i32, %c0_i32_0 : i32, i32
  }
  func.func @transform_6(%arg0: i32) -> (i32, i32) {
    %c0_i32 = arith.constant 0 : i32
    %c0_i32_0 = arith.constant 0 : i32
    %c0_i32_1 = arith.constant 0 : i32
    return %c0_i32, %c0_i32_0 : i32, i32
  }
  func.func @transform_7(%arg0: i32) -> (i32, i32) {
    %c0_i32 = arith.constant 0 : i32
    %c0_i32_0 = arith.constant 0 : i32
    return %arg0, %c0_i32 : i32, i32
  }
}

</mosaic_0001>

<bundles_post_ra>
// kernel: tpu_custom_call.1
= control target key start
LH: loop header
LB: loop body
LE: loop exit
PB: predicated region body
PF: predicated region fallthrough
CT: control target
= control target key end

     0   :  { %vm39_vm0 = vcmask 1041408   ;;  %vm35_vm1 = vcmask 15360   ;;  %v425_v0 = vmov 0.0   ;;  %vm426_vm2 = vmmov 0   ;;  %s620_s1 = inlined_call_operand.vmem [shape: f32[2,128], index: 1, kind: input, shape index: {}]   ;;  %s621_s0 = inlined_call_operand.vmem [shape: f32[8,2], index: 0, kind: input, shape index: {}]   ;;  %s622_s3 = inlined_call_operand.vmem [shape: f32[128,128], index: 3, kind: input, shape index: {}]   ;;  %s623_s5 = inlined_call_operand.vmem [shape: f32[128,4], index: 5, kind: input, shape index: {}]   ;;  %s624_s2 = inlined_call_operand.vmem [shape: f32[1,128], index: 2, kind: input, shape index: {}]   ;;  %s625_s4 = inlined_call_operand.vmem [shape: f32[1,128], index: 4, kind: input, shape index: {}]   ;;  %s626_s6 = inlined_call_operand.vmem [shape: f32[1,4], index: 6, kind: input, shape index: {}]   ;;  %s627_s7 = inlined_call_operand.vmem [shape: f32[8,4], index: 7, kind: output, shape index: {}]  }
   0x1   :  { %348 = vmatprep.subr.mxu0 %v425_v0  ;;  %v27_v1 = vld [vmem:[%s620_s1] sm:$0x3]  ;;  %350 = vmatprep.mubr.msk.f32.mxu0 %vm426_vm2, %v425_v0  ;;  %v129_v3 = vld [vmem:[%s622_s3 + $0x78] sm:$0xff]  ;;  %v128_v4 = vld [vmem:[%s622_s3 + $0x70] sm:$0xff]  ;;  %vm301_vm3 = vcmask 31744  }
   0x2   :  { %v26_v2 = vld [vmem:[%s621_s0] sm:$0xff]  ;;  %349 = vmatpush3.msk.msra.mxu0 %vm39_vm0, %v27_v1  ;;  %353 = vmatprep.subr.mxu1 %v425_v0  ;;  %v127_v5 = vld [vmem:[%s622_s3 + $0x68] sm:$0xff]  ;;  %v125_v7 = vld [vmem:[%s622_s3 + $0x58] sm:$0xff] }
   0x3   :  { %351 = vmatmul.mubr.msk.f32.vlgmr.msra.gmra.mxu0 %vm35_vm1, %v26_v2  ;;  %354 = vmatpush3.msra.mxu1 %v129_v3  ;;  %v126_v6 = vld [vmem:[%s622_s3 + $0x60] sm:$0xff]  ;;  %v124_v8 = vld [vmem:[%s622_s3 + $0x50] sm:$0xff]  ;;  %v123_v9 = vld [vmem:[%s622_s3 + $0x48] sm:$0xff] }
   0x4   :  { %355 = vmatprep.subr.mxu1 %v425_v0  ;;  %385 = vmatprep.mubr.msk.f32.mxu1 %vm426_vm2, %v425_v0  ;;  %v122_v10 = vld [vmem:[%s622_s3 + $0x40] sm:$0xff]  ;;  %v121_v11 = vld [vmem:[%s622_s3 + $0x38] sm:$0xff]  ;;  %v120_v12 = vld [vmem:[%s622_s3 + $0x30] sm:$0xff] }
   0x5   :  { %356 = vmatpush3.msra.mxu1 %v128_v4  ;;  %388 = vmatprep.subr.mxu0 %v425_v0  ;;  %v119_v13 = vld [vmem:[%s622_s3 + $0x28] sm:$0xff]  ;;  %v118_v14 = vld [vmem:[%s622_s3 + $0x20] sm:$0xff]  ;;  %v117_v15 = vld [vmem:[%s622_s3 + $0x18] sm:$0xff] }
   0x6   :  { %357 = vmatprep.subr.mxu1 %v425_v0  ;;  %420 = vmatprep.mubr.msk.f32.mxu0 %vm426_vm2, %v425_v0  ;;  %v116_v16 = vld [vmem:[%s622_s3 + $0x10] sm:$0xff]  ;;  %v115_v17 = vld [vmem:[%s622_s3 + $0x8] sm:$0xff]  ;;  %v114_v18 = vld [vmem:[%s622_s3] sm:$0xff] }
   0x7   :  { %358 = vmatpush3.msra.mxu1 %v127_v5  ;;  %v223_v19 = vld [vmem:[%s623_s5 + $0x78] sm:$0xff]  ;;  %v222_v20 = vld [vmem:[%s623_s5 + $0x70] sm:$0xff]  ;;  %v221_v21 = vld [vmem:[%s623_s5 + $0x68] sm:$0xff] }
   0x8   :  { %359 = vmatprep.subr.mxu1 %v425_v0  ;;  %389 = vmatpush3.msra.mxu0 %v223_v19  ;;  %v220_v22 = vld [vmem:[%s623_s5 + $0x60] sm:$0xff]  ;;  %v219_v23 = vld [vmem:[%s623_s5 + $0x58] sm:$0xff]  ;;  %v218_v24 = vld [vmem:[%s623_s5 + $0x50] sm:$0xff] }
   0x9   :  { %360 = vmatpush3.msra.mxu1 %v126_v6  ;;  %390 = vmatprep.subr.mxu0 %v425_v0  ;;  %v217_v25 = vld [vmem:[%s623_s5 + $0x48] sm:$0xff]  ;;  %v216_v26 = vld [vmem:[%s623_s5 + $0x40] sm:$0xff]  ;;  %v215_v27 = vld [vmem:[%s623_s5 + $0x38] sm:$0xff] }
   0xa   :  { %361 = vmatprep.subr.mxu1 %v425_v0  ;;  %391 = vmatpush3.msra.mxu0 %v222_v20  ;;  %v214_v28 = vld [vmem:[%s623_s5 + $0x30] sm:$0xff]  ;;  %v213_v29 = vld [vmem:[%s623_s5 + $0x28] sm:$0xff]  ;;  %v212_v30 = vld [vmem:[%s623_s5 + $0x20] sm:$0xff] }
   0xb   :  { %362 = vmatpush3.msra.mxu1 %v125_v7  ;;  %392 = vmatprep.subr.mxu0 %v425_v0  ;;  %v211_v31 = vld [vmem:[%s623_s5 + $0x18] sm:$0xff]  ;;  %v307_v32 = vld [vmem:[%s624_s2] ss:$0 sm:$0xff]  ;;  %v210_v37 = vld [vmem:[%s623_s5 + $0x10] sm:$0xff] }
   0xc   :  { %363 = vmatprep.subr.mxu1 %v425_v0  ;;  %393 = vmatpush3.msra.mxu0 %v221_v21  ;;  %v209_v38 = vld [vmem:[%s623_s5 + $0x8] sm:$0xff]  ;;  %v208_v39 = vld [vmem:[%s623_s5] sm:$0xff] }
   0xd   :  { %364 = vmatpush3.msra.mxu1 %v124_v8  ;;  %394 = vmatprep.subr.mxu0 %v425_v0  ;;  %v310_v40 = vld [vmem:[%s625_s4] ss:$0 sm:$0xff] }
   0xe   :  { %365 = vmatprep.subr.mxu1 %v425_v0  ;;  %395 = vmatpush3.msra.mxu0 %v220_v22  ;;  %v311_v45 = vld [vmem:[%s626_s6] ss:$0 sm:$0xff] }
   0xf   :  { %366 = vmatpush3.msra.mxu1 %v123_v9  ;;  %396 = vmatprep.subr.mxu0 %v425_v0 }
  0x10   :  { %367 = vmatprep.subr.mxu1 %v425_v0  ;;  %397 = vmatpush3.msra.mxu0 %v219_v23 }
  0x11   :  { %368 = vmatpush3.msra.mxu1 %v122_v10  ;;  %398 = vmatprep.subr.mxu0 %v425_v0 }
  0x12   :  { %369 = vmatprep.subr.mxu1 %v425_v0  ;;  %399 = vmatpush3.msra.mxu0 %v218_v24 }
  0x13   :  { %370 = vmatpush3.msra.mxu1 %v121_v11  ;;  %400 = vmatprep.subr.mxu0 %v425_v0 }
  0x14   :  { %371 = vmatprep.subr.mxu1 %v425_v0  ;;  %401 = vmatpush3.msra.mxu0 %v217_v25 }
  0x15   :  { %372 = vmatpush3.msra.mxu1 %v120_v12  ;;  %402 = vmatprep.subr.mxu0 %v425_v0 }
  0x16   :  { %373 = vmatprep.subr.mxu1 %v425_v0  ;;  %403 = vmatpush3.msra.mxu0 %v216_v26 }
  0x17   :  { %374 = vmatpush3.msra.mxu1 %v119_v13  ;;  %404 = vmatprep.subr.mxu0 %v425_v0 }
  0x18   :  { %375 = vmatprep.subr.mxu1 %v425_v0  ;;  %405 = vmatpush3.msra.mxu0 %v215_v27 }
  0x19   :  { %376 = vmatpush3.msra.mxu1 %v118_v14  ;;  %406 = vmatprep.subr.mxu0 %v425_v0 }
  0x1a   :  { %377 = vmatprep.subr.mxu1 %v425_v0  ;;  %407 = vmatpush3.msra.mxu0 %v214_v28 }
  0x1b   :  { %378 = vmatpush3.msra.mxu1 %v117_v15  ;;  %408 = vmatprep.subr.mxu0 %v425_v0 }
  0x1c   :  { %379 = vmatprep.subr.mxu1 %v425_v0  ;;  %409 = vmatpush3.msra.mxu0 %v213_v29 }
  0x1d   :  { %380 = vmatpush3.msra.mxu1 %v116_v16  ;;  %410 = vmatprep.subr.mxu0 %v425_v0 }
  0x1e   :  { %381 = vmatprep.subr.mxu1 %v425_v0  ;;  %411 = vmatpush3.msra.mxu0 %v212_v30 }
  0x1f   :  { %382 = vmatpush3.msra.mxu1 %v115_v17  ;;  %412 = vmatprep.subr.mxu0 %v425_v0 }
  0x20   :  { %383 = vmatprep.subr.mxu1 %v425_v0  ;;  %413 = vmatpush3.msra.mxu0 %v211_v31 }
  0x21   :  { %384 = vmatpush3.msra.mxu1 %v114_v18  ;;  %414 = vmatprep.subr.mxu0 %v425_v0 }
  0x22   :  { %415 = vmatpush3.msra.mxu0 %v210_v37 }
  0x23   :  { %416 = vmatprep.subr.mxu0 %v425_v0 }
  0x24   :  { %417 = vmatpush3.msra.mxu0 %v209_v38 }
  0x25   :  { %418 = vmatprep.subr.mxu0 %v425_v0 }
  0x26   :  { %419 = vmatpush3.msra.mxu0 %v208_v39 }
  0xc3   :  { %v109_v33 = vpop.f32.mrf.mxu0 }
  0xc4   :  { %v110_v34 = vadd.f32 %v307_v32, %v109_v33 }
  0xc5   :  { %v352_v35 = vpop.f32.mrf.mxu0 }
  0xc6   :  { %v113_v36 = vmax.f32 %v110_v34, 0.0 }
  0xc8   :  { %386 = vmatmul.mubr.f32.vlgmr.msra.gmra.mxu1 %v113_v36 }
 0x188   :  { %v203_v41 = vpop.f32.mrf.mxu1 }
 0x189   :  { %v204_v42 = vadd.f32 %v310_v40, %v203_v41 }
 0x18a   :  { %v387_v43 = vpop.f32.mrf.mxu1 }
 0x18b   :  { %v207_v44 = vmax.f32 %v204_v42, 0.0 }
 0x18d   :  { %421 = vmatmul.mubr.f32.vlgmr.msra.gmra.mxu0 %v207_v44 }
 0x24d   :  { %v297_v46 = vpop.f32.mrf.mxu0 }
 0x24e   :  { %v298_v47 = vadd.f32 %v311_v45, %v297_v46 }
 0x24f   :  { %v422_v48 = vpop.f32.mrf.mxu0 }
 0x250   :  { %302 = vst.msk [vmem:[%s627_s7] sm:$0xff] %vm301_vm3, %v298_v47 }

</bundles_post_ra>
